<compile_context>
chip_gen: v7x
topology: tpu7x:2x2x1
jax: 0.10.0
libtpu: 0.0.40
codegen_flags: <defaults>
</compile_context>

<pallas_src>
import math
import numpy as np
import jax
import jax.numpy as jnp
from jax.experimental import pallas as pl
from jax.experimental.pallas import tpu as pltpu


# ----------------------------------------------------------------------------
# Pallas kernel
# ----------------------------------------------------------------------------
def make_resblock_kernel(H, W, C):
    S = H * W
    inv_sqrt2 = 1.0 / math.sqrt(2.0)
    inv_S = 1.0 / S

    def _erf(x):
        # Abramowitz & Stegun 7.1.26 rational approximation (|err| < 1.5e-7).
        # exp and the approximate reciprocal both run on the EUP slot, keeping
        # the VALU free for the polynomial.
        a1, a2, a3, a4, a5 = (0.254829592, -0.284496736, 1.421413741,
                              -1.453152027, 1.061405429)
        pc = 0.3275911
        sgn = jnp.where(x >= 0.0, 1.0, -1.0)
        ax = jnp.abs(x)
        t = pl.reciprocal(1.0 + pc * ax, approx=True)
        poly = ((((a5 * t + a4) * t + a3) * t + a2) * t + a1) * t
        return sgn * (1.0 - poly * jnp.exp(-ax * ax))

    def _gelu_exact(x):
        return 0.5 * x * (1.0 + _erf(x * inv_sqrt2))

    def _instance_norm(y):
        # y: (C, S) f32.  Per-channel stats over the spatial (lane) axis in ONE
        # pass; biased variance, eps=1e-5 (PyTorch InstanceNorm2d defaults).
        s1 = jnp.sum(y, axis=1, keepdims=True)
        s2 = jnp.sum(y * y, axis=1, keepdims=True)
        mu = s1 * inv_S
        var = jnp.maximum(s2 * inv_S - mu * mu, 0.0)   # guard cancellation
        return (y - mu) * jax.lax.rsqrt(var + 1e-5)

    def _conv3x3_reflect(x, w_ref, masks):
        # x: (C, S) f32, spatial flattened row-major (p = h*W + w).
        # w_ref: (3, Cout, 3*Cin) bf16; leading index = dx tap (kw), columns
        #        ordered (dy, cin).
        # Returns (Cout, S) f32 = ReflectionPad2d(1) followed by VALID 3x3 conv,
        # computed as 3 accumulated per-dx MXU matmuls so only one (3*Cin, S)
        # bf16 rhs is live at a time.
        #
        # Tap (dy, dx) needs x[c, reflect(h+dy), reflect(w+dx)].  Interior
        # values come from XLU lane rolls of the flat array; boundary lanes
        # where the roll wraps into the wrong row are replaced (select) by the
        # opposite-direction roll, which is exactly the reflection value.
        is_w0, is_wl, is_h0, is_hl = masks
        c_m = pltpu.roll(x, 1, axis=1)        # x[c, p-1]  (left neighbour)
        c_p = pltpu.roll(x, S - 1, axis=1)    # x[c, p+1]  (right neighbour)
        acc = None
        for dxi, dx in enumerate((-1, 0, 1)):
            if dx == -1:
                a = jnp.where(is_w0, c_p, c_m)     # col w-1, reflect(-1) = 1
            elif dx == 0:
                a = x
            else:
                a = jnp.where(is_wl, c_m, c_p)     # col w+1, reflect(W) = W-2
            r_up = pltpu.roll(a, W, axis=1)        # a[c, p-W]  (row above)
            r_dn = pltpu.roll(a, S - W, axis=1)    # a[c, p+W]  (row below)
            p_up = jnp.where(is_h0, r_dn, r_up)    # dy=-1, reflect(-1) = 1
            p_dn = jnp.where(is_hl, r_up, r_dn)    # dy=+1, reflect(H) = H-2
            rhs = jnp.concatenate([p_up, a, p_dn], axis=0).astype(jnp.bfloat16)
            term = jnp.dot(w_ref[dxi], rhs,
                           preferred_element_type=jnp.float32)   # (Cout, S) f32
            acc = term if acc is None else acc + term
        return acc

    def kernel(x_ref, w1_ref, w2_ref, o_ref):
        x = x_ref[0]                                           # (C, S) f32
        # Boundary masks built directly in lane space (no (H,W) iota+reshape).
        p = jax.lax.broadcasted_iota(jnp.int32, (1, S), 1)
        if (W & (W - 1)) == 0:
            col = jnp.bitwise_and(p, W - 1)
        else:
            col = p % W
        masks = (col == 0, col == W - 1, p < W, p >= S - W)

        y = _conv3x3_reflect(x, w1_ref, masks)    # conv1 (bias cancels in IN)
        y = _gelu_exact(_instance_norm(y))        # IN + exact GELU
        z = _instance_norm(_conv3x3_reflect(y, w2_ref, masks))   # conv2 + IN
        o_ref[0] = (x + z).astype(o_ref.dtype)    # residual add, exact f32 path

    return kernel


# ----------------------------------------------------------------------------
# Wrapper
# ----------------------------------------------------------------------------
def _pack_conv_weight(w):
    # PyTorch OIHW (O, I, 3, 3) -> (3, O, 3*I): leading index = kw (dx tap),
    # columns ordered (kh, i) = (dy, cin), matching the kernel's per-dx rhs.
    O, I, KH, KW = w.shape
    return jnp.transpose(w, (3, 0, 2, 1)).reshape(KW, O, KH * I).astype(jnp.bfloat16)


def resblock_pallas(x_nchw, w1, b1, w2, b2):
    """x_nchw: (B, C, H, W) f32.  w*: (C, C, 3, 3) OIHW.  b*: (C,) (unused)."""
    # Per-channel conv bias added right before affine=False InstanceNorm is
    # removed exactly by the mean subtraction -> dead compute, dropped.
    del b1, b2
    B, C, H, W = x_nchw.shape
    S = H * W
    assert H >= 2 and W >= 2, "ReflectionPad2d(1) requires H, W >= 2"

    x_flat = x_nchw.reshape(B, C, S).astype(jnp.float32)   # free reshape of NCHW
    w1m = _pack_conv_weight(w1)
    w2m = _pack_conv_weight(w2)

    # Scoped-VMEM budget sized to the real working set (2x headroom, floored at
    # the 32 MiB default so tiny shapes never under-provision).
    io_bytes = 2 * 2 * C * S * 4             # x + out blocks, double-buffered f32
    w_bytes = 2 * 2 * (9 * C * C) * 2        # two packed bf16 weights (2 buffers)
    act_bytes = 8 * C * S * 4                # y/z/acc + roll/select temporaries
    rhs_bytes = 2 * 3 * C * S * 2            # per-dx bf16 rhs (one live + slack)
    est = io_bytes + w_bytes + act_bytes + rhs_bytes
    vmem_limit = int(min(max(2 * est + (2 << 20), 32 << 20), 100 << 20))

    kernel = make_resblock_kernel(H, W, C)
    out_flat = pl.pallas_call(
        kernel,
        out_shape=jax.ShapeDtypeStruct((B, C, S), jnp.float32),
        grid=(B,),
        in_specs=[
            pl.BlockSpec((1, C, S), lambda b: (b, 0, 0)),        # x, lane-dense
            pl.BlockSpec((3, C, 3 * C), lambda b: (0, 0, 0)),    # conv1 weights (bf16)
            pl.BlockSpec((3, C, 3 * C), lambda b: (0, 0, 0)),    # conv2 weights (bf16)
        ],
        out_specs=pl.BlockSpec((1, C, S), lambda b: (b, 0, 0)),
        compiler_params=pltpu.CompilerParams(
            dimension_semantics=("parallel",),     # shard batch over TCs (v7x)
            vmem_limit_bytes=vmem_limit),
    )(x_flat, w1m, w2m)
    return out_flat.reshape(B, C, H, W)


# ----------------------------------------------------------------------------
# Pure-JAX reference (mirrors the PyTorch module exactly, with biases)
# ----------------------------------------------------------------------------
def resblock_ref(x, w1, b1, w2, b2):
    def conv(inp, w, b):
        y = jax.lax.conv_general_dilated(
            inp, w, window_strides=(1, 1), padding="VALID",
            dimension_numbers=("NCHW", "OIHW", "NCHW"),
            precision=jax.lax.Precision.HIGHEST)
        return y + b[None, :, None, None]

    def inorm(y):
        mu = jnp.mean(y, axis=(2, 3), keepdims=True)
        var = jnp.mean(jnp.square(y - mu), axis=(2, 3), keepdims=True)
        return (y - mu) / jnp.sqrt(var + 1e-5)

    xp = jnp.pad(x, ((0, 0), (0, 0), (1, 1), (1, 1)), mode="reflect")
    y = jax.nn.gelu(inorm(conv(xp, w1, b1)), approximate=False)
    yp = jnp.pad(y, ((0, 0), (0, 0), (1, 1), (1, 1)), mode="reflect")
    z = inorm(conv(yp, w2, b2))
    return x + z


# ----------------------------------------------------------------------------
# Main
# ----------------------------------------------------------------------------
if __name__ == "__main__":
    # Small harness shape; tune at realistic shapes (C>=128, H=W>=64, B>=2).
    B, C, H, W = 2, 4, 16, 16
    key = jax.random.PRNGKey(0)
    kx, kw1, kb1, kw2, kb2 = jax.random.split(key, 5)

    x = jax.random.normal(kx, (B, C, H, W), dtype=jnp.float32)

    # Deterministic PyTorch-Conv2d-style init: uniform(-k, k), k = 1/sqrt(fan_in).
    fan_in = C * 3 * 3
    k = 1.0 / math.sqrt(fan_in)
    w1 = jax.random.uniform(kw1, (C, C, 3, 3), jnp.float32, -k, k)
    b1 = jax.random.uniform(kb1, (C,), jnp.float32, -k, k)
    w2 = jax.random.uniform(kw2, (C, C, 3, 3), jnp.float32, -k, k)
    b2 = jax.random.uniform(kb2, (C,), jnp.float32, -k, k)

    out = jax.block_until_ready(resblock_pallas(x, w1, b1, w2, b2))
    ref = jax.block_until_ready(resblock_ref(x, w1, b1, w2, b2))

    assert out.shape == (B, C, H, W), out.shape
    # Conv matmuls run natively in bf16 on the MXU (f32 accumulate) and the
    # IN-cancelled conv biases are omitted; 2e-2 comfortably bounds the bf16
    # rounding + approx-reciprocal erf vs. the exact-f32 reference.
    np.testing.assert_allclose(np.asarray(out), np.asarray(ref), rtol=2e-2, atol=2e-2)

    print("KERNEL_OK")
</pallas_src>

<mosaic_0001>
module attributes {stable_mosaic.version = 11 : i64} {
  func.func @kernel(%arg0: i32, %arg1: memref<1x4x256xf32, #tpu.memory_space<vmem>>, %arg2: memref<3x4x12xbf16, #tpu.memory_space<vmem>>, %arg3: memref<3x4x12xbf16, #tpu.memory_space<vmem>>, %arg4: memref<1x4x256xf32, #tpu.memory_space<vmem>>) attributes {dimension_semantics = [#tpu.dimension_semantics<parallel>], iteration_bounds = array<i64: 2>, scalar_prefetch = 0 : i64, scratch_operands = 0 : i64, tpu.core_type = #tpu.core_type<tc>, window_params = [{transform_indices = @transform_0, window_bounds = array<i64: 1, 4, 256>}, {pipeline_mode = #tpu.pipeline_mode<synchronous>, transform_indices = @transform_1, window_bounds = array<i64: 3, 4, 12>}, {pipeline_mode = #tpu.pipeline_mode<synchronous>, transform_indices = @transform_2, window_bounds = array<i64: 3, 4, 12>}, {transform_indices = @transform_3, window_bounds = array<i64: 1, 4, 256>}]} {
    %c0 = arith.constant 0 : index
    %c0_0 = arith.constant 0 : index
    %c0_1 = arith.constant 0 : index
    %0 = vector.load %arg1[%c0, %c0_0, %c0_1] : memref<1x4x256xf32, #tpu.memory_space<vmem>>, vector<1x4x256xf32>
    %1 = vector.shape_cast %0 : vector<1x4x256xf32> to vector<4x256xf32>
    %2 = tpu.iota {dimensions = array<i32: 1>} : vector<1x256xi32>
    %c15_i32 = arith.constant 15 : i32
    %3 = vector.broadcast %c15_i32 : i32 to vector<1x256xi32>
    %4 = arith.andi %2, %3 : vector<1x256xi32>
    %c0_i32 = arith.constant 0 : i32
    %5 = vector.broadcast %c0_i32 : i32 to vector<1x256xi32>
    %6 = arith.cmpi eq, %4, %5 : vector<1x256xi32>
    %c15_i32_2 = arith.constant 15 : i32
    %7 = vector.broadcast %c15_i32_2 : i32 to vector<1x256xi32>
    %8 = arith.cmpi eq, %4, %7 : vector<1x256xi32>
    %c16_i32 = arith.constant 16 : i32
    %9 = vector.broadcast %c16_i32 : i32 to vector<1x256xi32>
    %10 = arith.cmpi slt, %2, %9 : vector<1x256xi32>
    %c240_i32 = arith.constant 240 : i32
    %11 = vector.broadcast %c240_i32 : i32 to vector<1x256xi32>
    %12 = arith.cmpi sge, %2, %11 : vector<1x256xi32>
    %c1_i32 = arith.constant 1 : i32
    %13 = tpu.dynamic_rotate %1 by %c1_i32 dim 1 : vector<4x256xf32>, i32 -> vector<4x256xf32>
    %c255_i32 = arith.constant 255 : i32
    %14 = tpu.dynamic_rotate %1 by %c255_i32 dim 1 : vector<4x256xf32>, i32 -> vector<4x256xf32>
    %15 = vector.shape_cast %6 : vector<1x256xi1> to vector<1x256xi1>
    %16 = vector.broadcast %15 : vector<1x256xi1> to vector<4x256xi1>
    %17 = arith.select %16, %14, %13 : vector<4x256xi1>, vector<4x256xf32>
    %c16_i32_3 = arith.constant 16 : i32
    %18 = tpu.dynamic_rotate %17 by %c16_i32_3 dim 1 : vector<4x256xf32>, i32 -> vector<4x256xf32>
    %c240_i32_4 = arith.constant 240 : i32
    %19 = tpu.dynamic_rotate %17 by %c240_i32_4 dim 1 : vector<4x256xf32>, i32 -> vector<4x256xf32>
    %20 = vector.shape_cast %10 : vector<1x256xi1> to vector<1x256xi1>
    %21 = vector.broadcast %20 : vector<1x256xi1> to vector<4x256xi1>
    %22 = arith.select %21, %19, %18 : vector<4x256xi1>, vector<4x256xf32>
    %23 = vector.shape_cast %12 : vector<1x256xi1> to vector<1x256xi1>
    %24 = vector.broadcast %23 : vector<1x256xi1> to vector<4x256xi1>
    %25 = arith.select %24, %18, %19 : vector<4x256xi1>, vector<4x256xf32>
    %26 = tpu.concatenate %22, %17, %25 in 0 : vector<4x256xf32>, vector<4x256xf32>, vector<4x256xf32> -> vector<12x256xf32>
    %27 = arith.truncf %26 : vector<12x256xf32> to vector<12x256xbf16>
    %c0_5 = arith.constant 0 : index
    %c0_6 = arith.constant 0 : index
    %c0_7 = arith.constant 0 : index
    %28 = vector.load %arg2[%c0_5, %c0_6, %c0_7] : memref<3x4x12xbf16, #tpu.memory_space<vmem>>, vector<1x4x12xbf16>
    %29 = vector.shape_cast %28 : vector<1x4x12xbf16> to vector<4x12xbf16>
    %cst = arith.constant dense<0.000000e+00> : vector<4x256xf32>
    %30 = tpu.matmul %29, %27, %cst {dimension_numbers = #tpu.dot_dimension_numbers<[1], [0], [0], [1], [0, 0, 1, 1], [], []>} : vector<4x12xbf16>, vector<12x256xbf16>, vector<4x256xf32> -> vector<4x256xf32>
    %c16_i32_8 = arith.constant 16 : i32
    %31 = tpu.dynamic_rotate %1 by %c16_i32_8 dim 1 : vector<4x256xf32>, i32 -> vector<4x256xf32>
    %c240_i32_9 = arith.constant 240 : i32
    %32 = tpu.dynamic_rotate %1 by %c240_i32_9 dim 1 : vector<4x256xf32>, i32 -> vector<4x256xf32>
    %33 = vector.shape_cast %10 : vector<1x256xi1> to vector<1x256xi1>
    %34 = vector.broadcast %33 : vector<1x256xi1> to vector<4x256xi1>
    %35 = arith.select %34, %32, %31 : vector<4x256xi1>, vector<4x256xf32>
    %36 = vector.shape_cast %12 : vector<1x256xi1> to vector<1x256xi1>
    %37 = vector.broadcast %36 : vector<1x256xi1> to vector<4x256xi1>
    %38 = arith.select %37, %31, %32 : vector<4x256xi1>, vector<4x256xf32>
    %39 = tpu.concatenate %35, %1, %38 in 0 : vector<4x256xf32>, vector<4x256xf32>, vector<4x256xf32> -> vector<12x256xf32>
    %40 = arith.truncf %39 : vector<12x256xf32> to vector<12x256xbf16>
    %c1 = arith.constant 1 : index
    %c0_10 = arith.constant 0 : index
    %c0_11 = arith.constant 0 : index
    %41 = vector.load %arg2[%c1, %c0_10, %c0_11] : memref<3x4x12xbf16, #tpu.memory_space<vmem>>, vector<1x4x12xbf16>
    %42 = vector.shape_cast %41 : vector<1x4x12xbf16> to vector<4x12xbf16>
    %cst_12 = arith.constant dense<0.000000e+00> : vector<4x256xf32>
    %43 = tpu.matmul %42, %40, %cst_12 {dimension_numbers = #tpu.dot_dimension_numbers<[1], [0], [0], [1], [0, 0, 1, 1], [], []>} : vector<4x12xbf16>, vector<12x256xbf16>, vector<4x256xf32> -> vector<4x256xf32>
    %44 = arith.addf %30, %43 : vector<4x256xf32>
    %45 = vector.shape_cast %8 : vector<1x256xi1> to vector<1x256xi1>
    %46 = vector.broadcast %45 : vector<1x256xi1> to vector<4x256xi1>
    %47 = arith.select %46, %13, %14 : vector<4x256xi1>, vector<4x256xf32>
    %c16_i32_13 = arith.constant 16 : i32
    %48 = tpu.dynamic_rotate %47 by %c16_i32_13 dim 1 : vector<4x256xf32>, i32 -> vector<4x256xf32>
    %c240_i32_14 = arith.constant 240 : i32
    %49 = tpu.dynamic_rotate %47 by %c240_i32_14 dim 1 : vector<4x256xf32>, i32 -> vector<4x256xf32>
    %50 = vector.shape_cast %10 : vector<1x256xi1> to vector<1x256xi1>
    %51 = vector.broadcast %50 : vector<1x256xi1> to vector<4x256xi1>
    %52 = arith.select %51, %49, %48 : vector<4x256xi1>, vector<4x256xf32>
    %53 = vector.shape_cast %12 : vector<1x256xi1> to vector<1x256xi1>
    %54 = vector.broadcast %53 : vector<1x256xi1> to vector<4x256xi1>
    %55 = arith.select %54, %48, %49 : vector<4x256xi1>, vector<4x256xf32>
    %56 = tpu.concatenate %52, %47, %55 in 0 : vector<4x256xf32>, vector<4x256xf32>, vector<4x256xf32> -> vector<12x256xf32>
    %57 = arith.truncf %56 : vector<12x256xf32> to vector<12x256xbf16>
    %c2 = arith.constant 2 : index
    %c0_15 = arith.constant 0 : index
    %c0_16 = arith.constant 0 : index
    %58 = vector.load %arg2[%c2, %c0_15, %c0_16] : memref<3x4x12xbf16, #tpu.memory_space<vmem>>, vector<1x4x12xbf16>
    %59 = vector.shape_cast %58 : vector<1x4x12xbf16> to vector<4x12xbf16>
    %cst_17 = arith.constant dense<0.000000e+00> : vector<4x256xf32>
    %60 = tpu.matmul %59, %57, %cst_17 {dimension_numbers = #tpu.dot_dimension_numbers<[1], [0], [0], [1], [0, 0, 1, 1], [], []>} : vector<4x12xbf16>, vector<12x256xbf16>, vector<4x256xf32> -> vector<4x256xf32>
    %61 = arith.addf %44, %60 : vector<4x256xf32>
    %cst_18 = arith.constant dense<0.000000e+00> : vector<4xf32>
    %62 = vector.multi_reduction <add>, %61, %cst_18 [1] : vector<4x256xf32> to vector<4xf32>
    %63 = vector.shape_cast %62 : vector<4xf32> to vector<4x1xf32>
    %64 = arith.mulf %61, %61 : vector<4x256xf32>
    %cst_19 = arith.constant dense<0.000000e+00> : vector<4xf32>
    %65 = vector.multi_reduction <add>, %64, %cst_19 [1] : vector<4x256xf32> to vector<4xf32>
    %66 = vector.shape_cast %65 : vector<4xf32> to vector<4x1xf32>
    %cst_20 = arith.constant 3.906250e-03 : f32
    %67 = vector.broadcast %cst_20 : f32 to vector<4x1xf32>
    %68 = arith.mulf %63, %67 : vector<4x1xf32>
    %cst_21 = arith.constant 3.906250e-03 : f32
    %69 = vector.broadcast %cst_21 : f32 to vector<4x1xf32>
    %70 = arith.mulf %66, %69 : vector<4x1xf32>
    %71 = arith.mulf %68, %68 : vector<4x1xf32>
    %72 = arith.subf %70, %71 : vector<4x1xf32>
    %cst_22 = arith.constant 0.000000e+00 : f32
    %73 = vector.broadcast %cst_22 : f32 to vector<4x1xf32>
    %74 = arith.maximumf %72, %73 : vector<4x1xf32>
    %75 = vector.broadcast %68 : vector<4x1xf32> to vector<4x256xf32>
    %76 = arith.subf %61, %75 : vector<4x256xf32>
    %cst_23 = arith.constant 9.99999974E-6 : f32
    %77 = vector.broadcast %cst_23 : f32 to vector<4x1xf32>
    %78 = arith.addf %74, %77 : vector<4x1xf32>
    %79 = math.rsqrt %78 : vector<4x1xf32>
    %80 = vector.broadcast %79 : vector<4x1xf32> to vector<4x256xf32>
    %81 = arith.mulf %76, %80 : vector<4x256xf32>
    %cst_24 = arith.constant 5.000000e-01 : f32
    %82 = vector.broadcast %cst_24 : f32 to vector<4x256xf32>
    %83 = arith.mulf %82, %81 : vector<4x256xf32>
    %cst_25 = arith.constant 0.707106769 : f32
    %84 = vector.broadcast %cst_25 : f32 to vector<4x256xf32>
    %85 = arith.mulf %81, %84 : vector<4x256xf32>
    %cst_26 = arith.constant 0.000000e+00 : f32
    %86 = vector.broadcast %cst_26 : f32 to vector<4x256xf32>
    %87 = arith.cmpf oge, %85, %86 : vector<4x256xf32>
    %cst_27 = arith.constant 1.000000e+00 : f32
    %cst_28 = arith.constant -1.000000e+00 : f32
    %88 = vector.broadcast %cst_27 : f32 to vector<4x256xf32>
    %89 = vector.broadcast %cst_28 : f32 to vector<4x256xf32>
    %90 = arith.select %87, %88, %89 : vector<4x256xi1>, vector<4x256xf32>
    %91 = math.absf %85 : vector<4x256xf32>
    %cst_29 = arith.constant 0.327591091 : f32
    %92 = vector.broadcast %cst_29 : f32 to vector<4x256xf32>
    %93 = arith.mulf %92, %91 : vector<4x256xf32>
    %cst_30 = arith.constant 1.000000e+00 : f32
    %94 = vector.broadcast %cst_30 : f32 to vector<4x256xf32>
    %95 = arith.addf %94, %93 : vector<4x256xf32>
    %96 = tpu.reciprocal %95 {approx = true} : vector<4x256xf32> -> vector<4x256xf32>
    %cst_31 = arith.constant 1.06140542 : f32
    %97 = vector.broadcast %cst_31 : f32 to vector<4x256xf32>
    %98 = arith.mulf %97, %96 : vector<4x256xf32>
    %cst_32 = arith.constant -1.45315206 : f32
    %99 = vector.broadcast %cst_32 : f32 to vector<4x256xf32>
    %100 = arith.addf %98, %99 : vector<4x256xf32>
    %101 = arith.mulf %100, %96 : vector<4x256xf32>
    %cst_33 = arith.constant 1.42141378 : f32
    %102 = vector.broadcast %cst_33 : f32 to vector<4x256xf32>
    %103 = arith.addf %101, %102 : vector<4x256xf32>
    %104 = arith.mulf %103, %96 : vector<4x256xf32>
    %cst_34 = arith.constant -0.284496725 : f32
    %105 = vector.broadcast %cst_34 : f32 to vector<4x256xf32>
    %106 = arith.addf %104, %105 : vector<4x256xf32>
    %107 = arith.mulf %106, %96 : vector<4x256xf32>
    %cst_35 = arith.constant 0.254829586 : f32
    %108 = vector.broadcast %cst_35 : f32 to vector<4x256xf32>
    %109 = arith.addf %107, %108 : vector<4x256xf32>
    %110 = arith.mulf %109, %96 : vector<4x256xf32>
    %cst_36 = arith.constant 0.000000e+00 : f32
    %111 = vector.broadcast %cst_36 : f32 to vector<4x256xf32>
    %112 = arith.subf %111, %91 : vector<4x256xf32>
    %113 = arith.mulf %112, %91 : vector<4x256xf32>
    %114 = math.exp %113 : vector<4x256xf32>
    %115 = arith.mulf %110, %114 : vector<4x256xf32>
    %cst_37 = arith.constant 1.000000e+00 : f32
    %116 = vector.broadcast %cst_37 : f32 to vector<4x256xf32>
    %117 = arith.subf %116, %115 : vector<4x256xf32>
    %118 = arith.mulf %90, %117 : vector<4x256xf32>
    %cst_38 = arith.constant 1.000000e+00 : f32
    %119 = vector.broadcast %cst_38 : f32 to vector<4x256xf32>
    %120 = arith.addf %119, %118 : vector<4x256xf32>
    %121 = arith.mulf %83, %120 : vector<4x256xf32>
    %c1_i32_39 = arith.constant 1 : i32
    %122 = tpu.dynamic_rotate %121 by %c1_i32_39 dim 1 : vector<4x256xf32>, i32 -> vector<4x256xf32>
    %c255_i32_40 = arith.constant 255 : i32
    %123 = tpu.dynamic_rotate %121 by %c255_i32_40 dim 1 : vector<4x256xf32>, i32 -> vector<4x256xf32>
    %124 = vector.shape_cast %6 : vector<1x256xi1> to vector<1x256xi1>
    %125 = vector.broadcast %124 : vector<1x256xi1> to vector<4x256xi1>
    %126 = arith.select %125, %123, %122 : vector<4x256xi1>, vector<4x256xf32>
    %c16_i32_41 = arith.constant 16 : i32
    %127 = tpu.dynamic_rotate %126 by %c16_i32_41 dim 1 : vector<4x256xf32>, i32 -> vector<4x256xf32>
    %c240_i32_42 = arith.constant 240 : i32
    %128 = tpu.dynamic_rotate %126 by %c240_i32_42 dim 1 : vector<4x256xf32>, i32 -> vector<4x256xf32>
    %129 = vector.shape_cast %10 : vector<1x256xi1> to vector<1x256xi1>
    %130 = vector.broadcast %129 : vector<1x256xi1> to vector<4x256xi1>
    %131 = arith.select %130, %128, %127 : vector<4x256xi1>, vector<4x256xf32>
    %132 = vector.shape_cast %12 : vector<1x256xi1> to vector<1x256xi1>
    %133 = vector.broadcast %132 : vector<1x256xi1> to vector<4x256xi1>
    %134 = arith.select %133, %127, %128 : vector<4x256xi1>, vector<4x256xf32>
    %135 = tpu.concatenate %131, %126, %134 in 0 : vector<4x256xf32>, vector<4x256xf32>, vector<4x256xf32> -> vector<12x256xf32>
    %136 = arith.truncf %135 : vector<12x256xf32> to vector<12x256xbf16>
    %c0_43 = arith.constant 0 : index
    %c0_44 = arith.constant 0 : index
    %c0_45 = arith.constant 0 : index
    %137 = vector.load %arg3[%c0_43, %c0_44, %c0_45] : memref<3x4x12xbf16, #tpu.memory_space<vmem>>, vector<1x4x12xbf16>
    %138 = vector.shape_cast %137 : vector<1x4x12xbf16> to vector<4x12xbf16>
    %cst_46 = arith.constant dense<0.000000e+00> : vector<4x256xf32>
    %139 = tpu.matmul %138, %136, %cst_46 {dimension_numbers = #tpu.dot_dimension_numbers<[1], [0], [0], [1], [0, 0, 1, 1], [], []>} : vector<4x12xbf16>, vector<12x256xbf16>, vector<4x256xf32> -> vector<4x256xf32>
    %c16_i32_47 = arith.constant 16 : i32
    %140 = tpu.dynamic_rotate %121 by %c16_i32_47 dim 1 : vector<4x256xf32>, i32 -> vector<4x256xf32>
    %c240_i32_48 = arith.constant 240 : i32
    %141 = tpu.dynamic_rotate %121 by %c240_i32_48 dim 1 : vector<4x256xf32>, i32 -> vector<4x256xf32>
    %142 = vector.shape_cast %10 : vector<1x256xi1> to vector<1x256xi1>
    %143 = vector.broadcast %142 : vector<1x256xi1> to vector<4x256xi1>
    %144 = arith.select %143, %141, %140 : vector<4x256xi1>, vector<4x256xf32>
    %145 = vector.shape_cast %12 : vector<1x256xi1> to vector<1x256xi1>
    %146 = vector.broadcast %145 : vector<1x256xi1> to vector<4x256xi1>
    %147 = arith.select %146, %140, %141 : vector<4x256xi1>, vector<4x256xf32>
    %148 = tpu.concatenate %144, %121, %147 in 0 : vector<4x256xf32>, vector<4x256xf32>, vector<4x256xf32> -> vector<12x256xf32>
    %149 = arith.truncf %148 : vector<12x256xf32> to vector<12x256xbf16>
    %c1_49 = arith.constant 1 : index
    %c0_50 = arith.constant 0 : index
    %c0_51 = arith.constant 0 : index
    %150 = vector.load %arg3[%c1_49, %c0_50, %c0_51] : memref<3x4x12xbf16, #tpu.memory_space<vmem>>, vector<1x4x12xbf16>
    %151 = vector.shape_cast %150 : vector<1x4x12xbf16> to vector<4x12xbf16>
    %cst_52 = arith.constant dense<0.000000e+00> : vector<4x256xf32>
    %152 = tpu.matmul %151, %149, %cst_52 {dimension_numbers = #tpu.dot_dimension_numbers<[1], [0], [0], [1], [0, 0, 1, 1], [], []>} : vector<4x12xbf16>, vector<12x256xbf16>, vector<4x256xf32> -> vector<4x256xf32>
    %153 = arith.addf %139, %152 : vector<4x256xf32>
    %154 = vector.shape_cast %8 : vector<1x256xi1> to vector<1x256xi1>
    %155 = vector.broadcast %154 : vector<1x256xi1> to vector<4x256xi1>
    %156 = arith.select %155, %122, %123 : vector<4x256xi1>, vector<4x256xf32>
    %c16_i32_53 = arith.constant 16 : i32
    %157 = tpu.dynamic_rotate %156 by %c16_i32_53 dim 1 : vector<4x256xf32>, i32 -> vector<4x256xf32>
    %c240_i32_54 = arith.constant 240 : i32
    %158 = tpu.dynamic_rotate %156 by %c240_i32_54 dim 1 : vector<4x256xf32>, i32 -> vector<4x256xf32>
    %159 = vector.shape_cast %10 : vector<1x256xi1> to vector<1x256xi1>
    %160 = vector.broadcast %159 : vector<1x256xi1> to vector<4x256xi1>
    %161 = arith.select %160, %158, %157 : vector<4x256xi1>, vector<4x256xf32>
    %162 = vector.shape_cast %12 : vector<1x256xi1> to vector<1x256xi1>
    %163 = vector.broadcast %162 : vector<1x256xi1> to vector<4x256xi1>
    %164 = arith.select %163, %157, %158 : vector<4x256xi1>, vector<4x256xf32>
    %165 = tpu.concatenate %161, %156, %164 in 0 : vector<4x256xf32>, vector<4x256xf32>, vector<4x256xf32> -> vector<12x256xf32>
    %166 = arith.truncf %165 : vector<12x256xf32> to vector<12x256xbf16>
    %c2_55 = arith.constant 2 : index
    %c0_56 = arith.constant 0 : index
    %c0_57 = arith.constant 0 : index
    %167 = vector.load %arg3[%c2_55, %c0_56, %c0_57] : memref<3x4x12xbf16, #tpu.memory_space<vmem>>, vector<1x4x12xbf16>
    %168 = vector.shape_cast %167 : vector<1x4x12xbf16> to vector<4x12xbf16>
    %cst_58 = arith.constant dense<0.000000e+00> : vector<4x256xf32>
    %169 = tpu.matmul %168, %166, %cst_58 {dimension_numbers = #tpu.dot_dimension_numbers<[1], [0], [0], [1], [0, 0, 1, 1], [], []>} : vector<4x12xbf16>, vector<12x256xbf16>, vector<4x256xf32> -> vector<4x256xf32>
    %170 = arith.addf %153, %169 : vector<4x256xf32>
    %cst_59 = arith.constant dense<0.000000e+00> : vector<4xf32>
    %171 = vector.multi_reduction <add>, %170, %cst_59 [1] : vector<4x256xf32> to vector<4xf32>
    %172 = vector.shape_cast %171 : vector<4xf32> to vector<4x1xf32>
    %173 = arith.mulf %170, %170 : vector<4x256xf32>
    %cst_60 = arith.constant dense<0.000000e+00> : vector<4xf32>
    %174 = vector.multi_reduction <add>, %173, %cst_60 [1] : vector<4x256xf32> to vector<4xf32>
    %175 = vector.shape_cast %174 : vector<4xf32> to vector<4x1xf32>
    %cst_61 = arith.constant 3.906250e-03 : f32
    %176 = vector.broadcast %cst_61 : f32 to vector<4x1xf32>
    %177 = arith.mulf %172, %176 : vector<4x1xf32>
    %cst_62 = arith.constant 3.906250e-03 : f32
    %178 = vector.broadcast %cst_62 : f32 to vector<4x1xf32>
    %179 = arith.mulf %175, %178 : vector<4x1xf32>
    %180 = arith.mulf %177, %177 : vector<4x1xf32>
    %181 = arith.subf %179, %180 : vector<4x1xf32>
    %cst_63 = arith.constant 0.000000e+00 : f32
    %182 = vector.broadcast %cst_63 : f32 to vector<4x1xf32>
    %183 = arith.maximumf %181, %182 : vector<4x1xf32>
    %184 = vector.broadcast %177 : vector<4x1xf32> to vector<4x256xf32>
    %185 = arith.subf %170, %184 : vector<4x256xf32>
    %cst_64 = arith.constant 9.99999974E-6 : f32
    %186 = vector.broadcast %cst_64 : f32 to vector<4x1xf32>
    %187 = arith.addf %183, %186 : vector<4x1xf32>
    %188 = math.rsqrt %187 : vector<4x1xf32>
    %189 = vector.broadcast %188 : vector<4x1xf32> to vector<4x256xf32>
    %190 = arith.mulf %185, %189 : vector<4x256xf32>
    %191 = arith.addf %1, %190 : vector<4x256xf32>
    %c0_65 = arith.constant 0 : index
    %c0_66 = arith.constant 0 : index
    %c0_67 = arith.constant 0 : index
    %192 = vector.load %arg4[%c0_65, %c0_66, %c0_67] : memref<1x4x256xf32, #tpu.memory_space<vmem>>, vector<1x4x256xf32>
    %193 = vector.shape_cast %192 : vector<1x4x256xf32> to vector<4x256xf32>
    %194 = vector.shape_cast %191 : vector<4x256xf32> to vector<1x4x256xf32>
    tpu.vector_store %arg4[%c0_65, %c0_66, %c0_67], %194 {strides = array<i32>} : memref<1x4x256xf32, #tpu.memory_space<vmem>>, vector<1x4x256xf32>,
    return
  }
  func.func @transform_0(%arg0: i32) -> (i32, i32, i32) {
    %c0_i32 = arith.constant 0 : i32
    %c0_i32_0 = arith.constant 0 : i32
    %c0_i32_1 = arith.constant 0 : i32
    return %arg0, %c0_i32, %c0_i32_0 : i32, i32, i32
  }
  func.func @transform_1(%arg0: i32) -> (i32, i32, i32) {
    %c0_i32 = arith.constant 0 : i32
    %c0_i32_0 = arith.constant 0 : i32
    %c0_i32_1 = arith.constant 0 : i32
    %c0_i32_2 = arith.constant 0 : i32
    return %c0_i32, %c0_i32_0, %c0_i32_1 : i32, i32, i32
  }
  func.func @transform_2(%arg0: i32) -> (i32, i32, i32) {
    %c0_i32 = arith.constant 0 : i32
    %c0_i32_0 = arith.constant 0 : i32
    %c0_i32_1 = arith.constant 0 : i32
    %c0_i32_2 = arith.constant 0 : i32
    return %c0_i32, %c0_i32_0, %c0_i32_1 : i32, i32, i32
  }
  func.func @transform_3(%arg0: i32) -> (i32, i32, i32) {
    %c0_i32 = arith.constant 0 : i32
    %c0_i32_0 = arith.constant 0 : i32
    %c0_i32_1 = arith.constant 0 : i32
    return %arg0, %c0_i32, %c0_i32_0 : i32, i32, i32
  }
}

</mosaic_0001>

<bundles_post_ra>
// kernel: tpu_custom_call.1
= control target key start
LH: loop header
LB: loop body
LE: loop exit
PB: predicated region body
PF: predicated region fallthrough
CT: control target
= control target key end

     0   :  { %8 = vsyncpa [#allocation3], 0  ;;  %s1717_s0 = inlined_call_operand.hbm [shape: f32[2,4,256], index: 0, kind: input, shape index: {}]   ;;  %s1718_s1 = inlined_call_operand.hbm [shape: bf16[3,4,12], index: 1, kind: input, shape index: {}]   ;;  %s1719_s2 = inlined_call_operand.vmem [shape: bf16[3,4,12], index: 2, kind: input, shape index: {}]   ;;  %s1720_s3 = inlined_call_operand.hbm [shape: f32[2,4,256], index: 3, kind: output, shape index: {}]  }
   0x1   :  { %10 = vsyncpa [#allocation3 + $0x1], 0 }
   0x2   :  { %11 = vsyncpa [#allocation6], 0 }
   0x3   :  { %12 = vsyncpa [#allocation4], 0 }
   0x4   :  { %14 = vsyncpa [#allocation4 + $0x1], 0  ;;  %s1307_s12 = smov 0   ;;  %s1309_s13 = smov 0  }
   0x5   :  { %s1311_s14 = smov 0   ;;  %s1313_s15 = smov 0  }
   0x6 LB: > { %s1328_s16 = sadd.s32 4294967295, %s1274_s15   ;;  %s939_s17 = sadd.s32 4294967294, %s1274_s15   ;;  %s1274_s15 = sphi %s1313_s15, %s1748_s15   ;;  %s1270_s14 = sphi %s1311_s14, %s1747_s14   ;;  %s1266_s13 = sphi %s1309_s13, %s1746_s13   ;;  %s1262_s12 = sphi %s1307_s12, %s1745_s12  }
   0x7   : > { %p40_p0 = scmp.ne.s32.totalorder %s1266_s13, %s1262_s12  ;;  %p1721_p1 = scmp.eq.s32.totalorder %s1328_s16, 0 }
   0x8   : > { %p112_p3 = scmp.eq.s32.totalorder %s939_s17, 1  ;;  %p940_p5 = scmp.ge.s32.totalorder %s1274_s15, 1 }
   0x9   : > { %p1337_p4 = por %p1721_p1, %p40_p0  ;;  %p119_p7 = scmp.lt.s32.totalorder %s1274_s15, 3 }
   0xa   : > { %p1342_p6 = por %p112_p3, %p40_p0  ;;  %s1276_s21 = smov [#allocation5]  }
   0xb   : > { %s1724_s18 = scalar_select %p1337_p4, 1, 0 }
   0xc   : > { %s1725_s19 = scalar_select %p1342_p6, 1, 0 }
   0xd   : > { %p1347_p8 = pnand %p940_p5, %p119_p7  ;;  %s131_s22 = sshll.u32 %s1276_s21, 4  ;;  %s1351_s22 = int_to_ptr.vmem [resolvable:$true] %s131_s22 }
   0xe   : > { %s1363_s24 = sadd.s32 1, %s1274_s15   ;;  %s27_s25 = sadd.s32 1, %s1270_s14 }
   0xf   : > { %s1726_s20 = scalar_select %p1347_p8, 1, 0 }
  0x10   : > { %p995_p9 = pneg %p1347_p8  ;;  %s24_s26 = ssub.s32 %s1274_s15, %s1363_s24 }
  0x11   : > { %s1146_s29 = scalar_lea.hbm %s1718_s1, 96 }
  0x12   : > { %p1358_p11 = pnand %p995_p9, %p1721_p1  ;;  %p1147_p12 = scmp.ne.s32.totalorder %s1718_s1, %s1146_s29 }
  0x13   : > { %p1153_p5 = scmp.lt.u32.totalorder %s1146_s29, %s1718_s1 }
  0x14   : > { %p1148_p13 = pneg %p1358_p11 }
  0x16   : > { %p1149_p0 = pnand %p1148_p13, %p1147_p12 }
  0x18   : > { %p1150_p3 = pneg %p1149_p0 }
  0x1a   : > { %p1155_p7 = pnand %p1153_p5, %p1150_p3 }
  0x1c   : > { %1158 = shalt.err (!%p1155_p7)
}
  0x1d   : > { %s1159_s7 = scalar_lea.vmem %s1351_s22, 96  ;;  %p1167_p2 = scmp.lt.s32.totalorder %s1351_s22, %s1351_s22 }
  0x1e   : > { %p1160_p9 = scmp.ne.s32.totalorder %s1351_s22, %s1159_s7  ;;  %p1168_p6 = scmp.lt.s32.totalorder %s1159_s7, %s1159_s7 }
  0x20   : > { %p1162_p10 = pnand %p1160_p9, %p1148_p13  ;;  %p1169_p4 = por %p1168_p6, %p1167_p2 }
  0x22   : > { %p1163_p1 = pneg %p1162_p10 }
  0x24   : > { %p1170_p8 = pnand %p1169_p4, %p1163_p1 }
  0x26   : > { %1173 = shalt.err (!%p1170_p8)
}
  0x27   : > { %s1277_s8 = smov 32   ;;  %s1278_s9 = smov 2  }
  0x28   : > { %998 = dma.hbm_to_vmem [thread:$0]  (!%p1358_p11), %s1718_s1, 96, %s1351_s22, [#allocation6], %s1277_s8, %s1277_s8, %s1278_s9  }
  0x29   : > { %p25_p2 = scmp.eq.s32.totalorder %s24_s26, 0  ;;  %p34_p1 = scmp.ne.s32.totalorder %s1270_s14, %s1266_s13 }
  0x2a   : > { %p35_p4 = scmp.eq.s32.totalorder %s1274_s15, 0  ;;  %p1008_p6 = scmp.lt.s32.totalorder %s1274_s15, 2 }
  0x2b   : > { %s1394_s17 = scalar_select %p25_p2, %s1270_s14, %s27_s25  }
  0x2c   : > { %p36_p8 = por %p35_p4, %p34_p1  ;;  %p1728_p10 = scmp.eq.s32.totalorder %s1328_s16, 1 }
  0x2d   : > { %s148_s27 = sand.u32 1, %s1270_s14   ;;  %s969_s28 = sshll.u32 %s1274_s15, 7 }
  0x2e   : > { %p1398_p12 = por %p1728_p10, %p34_p1  ;;  %s943_s29 = sshll.u32 %s148_s27, 3 }
  0x2f   : > { %s1407_s4 = scalar_lea.hbm %s1717_s0, %s969_s28  ;;  %s152_s22 = scalar_lea.vmem [#allocation2], %s943_s29 }
  0x30   : > { %s160_s25 = sshll.u32 %s152_s22, 4  ;;  %p1409_p11 = pnand %p1008_p6, %p36_p8  ;;  %s1413_s25 = int_to_ptr.vmem [resolvable:$true] %s160_s25 }
  0x31   : > { %s149_s5 = scalar_lea.sflag [#allocation3], %s148_s27  ;;  %s1174_s6 = scalar_lea.hbm %s1407_s4, 128 }
  0x32   : > { %p1175_p13 = scmp.ne.s32.totalorder %s1407_s4, %s1174_s6  ;;  %p1176_p0 = pneg %p1409_p11 }
  0x33   : > { %s1179_s9 = scalar_lea.hbm %s1717_s0, 256  ;;  %p1180_p7 = scmp.lt.u32.totalorder %s1407_s4, %s1717_s0 }
  0x34   : > { %p1177_p3 = pnand %p1176_p0, %p1175_p13  ;;  %p1181_p9 = scmp.lt.u32.totalorder %s1179_s9, %s1174_s6 }
  0x35   : > { %p1183_p1 = scmp.lt.u32.totalorder %s1174_s6, %s1407_s4 }
  0x36   : > { %p1178_p5 = pneg %p1177_p3  ;;  %p1182_p2 = por %p1181_p9, %p1180_p7 }
  0x38   : > { %p1184_p4 = por %p1183_p1, %p1182_p2 }
  0x3a   : > { %p1185_p6 = pnand %p1184_p4, %p1178_p5 }
  0x3c   : > { %1188 = shalt.err (!%p1185_p6)
}
  0x3d   : > { %s1189_s27 = scalar_lea.vmem %s1413_s25, 128  ;;  %s1279_s28 = smov [#allocation2]  }
  0x3e   : > { %p1190_p8 = scmp.ne.s32.totalorder %s1413_s25, %s1189_s27  ;;  %s1194_s29 = sshll.u32 %s1279_s28, 4  ;;  %s1195_s29 = int_to_ptr.vmem [resolvable:$false] %s1194_s29 }
  0x3f   : > { %s1196_s23 = scalar_lea.vmem %s1195_s29, 256  ;;  %p1197_p3 = scmp.lt.s32.totalorder %s1413_s25, %s1195_s29 }
  0x40   : > { %p1192_p10 = pnand %p1190_p8, %p1176_p0  ;;  %p1198_p7 = scmp.lt.s32.totalorder %s1196_s23, %s1189_s27 }
  0x42   : > { %p1193_p13 = pneg %p1192_p10  ;;  %p1199_p9 = por %p1198_p7, %p1197_p3 }
  0x44   : > { %p1200_p2 = pnand %p1199_p9, %p1193_p13 }
  0x46   : > { %1203 = shalt.err (!%p1200_p2)
}
  0x47   : > { %1002 = dma.hbm_to_vmem [thread:$0]  (!%p1409_p11), %s1407_s4, 128, %s1413_s25, %s149_s5  }
  0x48   : > { %p1731_p5 = scmp.ne.s32.totalorder %s1726_s20, 0 }
  0x49   : > { %s1443_s30 = sand.u32 (!%p1731_p5), 1, %s1266_s13   ;;  %p1732_p0 = scmp.ne.s32.totalorder (!%p1731_p5), %s1724_s18, 0 }
  0x4a   : > { %169 = sbr.rel (%p1731_p5) target bundleno = 1447 (0x5a7), region = 32  ;;  %s947_s22 = sshll.u32 (!%p1731_p5), %s1443_s30, 3 }
  0x4b   : > { %s172_s6 = scalar_lea.sflag (!%p1731_p5), [#allocation3], %s1443_s30  ;;  %s175_s7 = scalar_lea.vmem (!%p1731_p5), [#allocation2], %s947_s22 }
  0x51   : > { %1249 = dma.done.wait (%p1732_p0), %s172_s6, 128  }
  0x52   : > { %1251 = vsyncadd (%p1732_p0), %s172_s6, 4294967168  ;;  %p1733_p11 = scmp.eq.s32.totalorder %s1328_s16, 0 }
  0x54   : > { %1253 = dma.done.wait (%p1733_p11), [#allocation6], 96   ;;  %p1734_p1 = pmov %p1733_p11 }
  0x55   : > { %v1457_v0 = vld [vmem:[%s175_s7] sm:$0xff]  ;;  %s1280_s20 = smov 1   ;;  %s1281_s4 = smov 16   ;;  %v1282_v3 = vmov 0   ;;  %v204_v4 = vlaneseq  ;;  %vm271_vm9 = vcmask 1043456   ;;  %vm305_vm10 = vcmask 1045504  }
  0x56   : > { %1255 = vsyncadd (%p1734_p1), [#allocation6], 4294967200  ;;  %v218_v1 = vcombine.high %v1457_v0, %v1457_v0  ;;  %344 = vmatprep.mubr.bf16.mxu0 %v1282_v3  ;;  %674 = vmatprep.mubr.bf16.mxu1 %v1282_v3  ;;  %s1283_s18 = smov 127   ;;  %s1284_s25 = smov 112   ;;  %v293_v27 = vcombine.low %v1457_v0, %v1457_v0  ;;  %v300_v47 = vld [vmem:[#allocation5 + $0x2] sm:$0x3] }
  0x57   : > { %v1468_v5 = vand.u32 127, %v204_v4  ;;  %vm301_vm11 = vcmask 97280   ;;  %s970_s27 = sshll.u32 %s1328_s16, 7  ;;  %s201_s28 = scalar_lea.vmem [#allocation7], %s947_s22 }
  0x58   : > { %v1052_v2 = vpack.i.bf16 %v218_v1, %v1457_v0  ;;  %s859_s29 = sshll.u32 %s201_s28, 4  ;;  %s1673_s7 = scalar_lea.hbm %s1720_s3, %s970_s27  ;;  %s1675_s29 = int_to_ptr.vmem [resolvable:$true] %s859_s29 }
  0x59   : > { %v1471_v6 = vadd.s32 128, %v1468_v5  ;;  %v207_v7 = vand.u32 15, %v1468_v5  ;;  %vm213_vm0 = vcmp.lt.s32.totalorder %v1468_v5, 16  ;;  %vm224_vm1 = vcmp.lt.s32.totalorder %v1468_v5, 1  ;;  %s1286_s16 = smov [#allocation7]  }
  0x5a   : > { %1053 = vrot.lane.b32.xlu0 %v1052_v2, %s1280_s20  ;;  %1063 = vrot.lane.b32.xlu1 %v1052_v2, %s1281_s4  ;;  %vm231_vm2 = vcmp.lt.s32.totalorder %v1468_v5, 127  ;;  %vm250_vm8 = vcmp.lt.s32.totalorder %v1468_v5, 112  ;;  %v604_v5 = vld [vmem:[%s1719_s2] sm:$0x3]  ;;  %s1208_s22 = sshll.u32 %s1286_s16, 4  ;;  %s1209_s22 = int_to_ptr.vmem [resolvable:$false] %s1208_s22 }
  0x5b   : > { %v208_v9 = vand.u32 15, %v1471_v6  ;;  %vm1478_vm3 = vcmp.eq.s32.totalorder %v207_v7, 0  ;;  %vm1482_vm4 = vcmp.eq.s32.totalorder %v207_v7, 15  ;;  %vm216_vm7 = vcmp.ge.s32.totalorder %v1471_v6, 240  ;;  %v961_v6 = vld [vmem:[%s1719_s2 + $0x4] sm:$0x3]  ;;  %p1211_p10 = scmp.lt.s32.totalorder %s1675_s29, %s1209_s22 }
  0x5d   : > { %vm1486_vm5 = vcmp.eq.s32.totalorder %v208_v9, 0  ;;  %vm1490_vm6 = vcmp.eq.s32.totalorder %v208_v9, 15 }
  0x5e   : > { %1058 = vrot.lane.b32.xlu0 %v1052_v2, %s1283_s18  ;;  %1068 = vrot.lane.b32.xlu1 %v1052_v2, %s1284_s25 }
  0xcc   : > { %v1054_v8 = vpop.permute.xlu0 %1053  ;;  %v1064_v10 = vpop.permute.xlu1 %1063 }
  0xcd   : > { %v1056_v11 = vunpack.i.h.bf16 %v1054_v8  ;;  %v1055_v12 = vunpack.i.l.bf16 %v1054_v8  ;;  %v1066_v13 = vunpack.i.h.bf16 %v1064_v10  ;;  %v1065_v14 = vunpack.i.l.bf16 %v1064_v10 }
  0xcf   : > { %v225_v25 = vsel %vm224_vm1, %v1055_v12, %v1056_v11  ;;  %v281_v26 = vsel %vm213_vm0, %v1065_v14, %v1066_v13  ;;  %v226_v28 = vsel %vm224_vm1, %v1056_v11, %v1055_v12  ;;  %v282_v31 = vsel %vm213_vm0, %v1066_v13, %v1065_v14 }
  0xd0   : > { %v1059_v17 = vpop.permute.xlu0 %1058  ;;  %v1069_v20 = vpop.permute.xlu1 %1068  ;;  %v296_v37 = vsel %vm271_vm9, %v281_v26, %v1457_v0 }
  0xd1   : > { %v1061_v21 = vunpack.i.h.bf16 %v1059_v17  ;;  %v1060_v22 = vunpack.i.l.bf16 %v1059_v17  ;;  %v1071_v23 = vunpack.i.h.bf16 %v1069_v20  ;;  %v1070_v24 = vunpack.i.l.bf16 %v1069_v20 }
  0xd3   : > { %v232_v29 = vsel %vm231_vm2, %v1060_v22, %v1061_v21  ;;  %v233_v30 = vsel %vm231_vm2, %v1061_v21, %v1060_v22  ;;  %v288_v34 = vsel %vm250_vm8, %v1071_v23, %v1070_v24  ;;  %v287_v35 = vsel %vm250_vm8, %v1070_v24, %v1071_v23 }
  0xd4   : > { %v238_v32 = vsel %vm1478_vm3, %v232_v29, %v226_v28  ;;  %v239_v33 = vsel %vm1486_vm5, %v233_v30, %v225_v25  ;;  %v407_v38 = vsel %vm1482_vm4, %v226_v28, %v232_v29  ;;  %v408_v39 = vsel %vm1490_vm6, %v225_v25, %v233_v30  ;;  %v276_v29 = vld [vmem:[#allocation5] sm:$0x3] }
  0xd5   : > { %v1077_v36 = vpack.i.bf16 %v239_v33, %v238_v32  ;;  %v292_v40 = vsel %vm216_vm7, %v281_v26, %v288_v34  ;;  %v289_v41 = vsel %vm213_vm0, %v287_v35, %v282_v31  ;;  %v1087_v44 = vpack.i.bf16 %v408_v39, %v407_v38  ;;  %v436_v31 = vld [vmem:[#allocation5 + $0x4] sm:$0x3] }
  0xd6   : > { %v298_v42 = vpack.c.bf16 %v292_v40, %v296_v37  ;;  %v295_v43 = vsel %vm271_vm9, %v289_v41, %v293_v27  ;;  %v268_v54 = vrot.slane %v239_v33, 4  ;;  %v267_v59 = vrot.slane %v238_v32, 4 }
  0xd7   : > { %1078 = vrot.lane.b32.xlu1 %v1077_v36, %s1284_s25  ;;  %1073 = vrot.lane.b32.xlu0 %v1077_v36, %s1281_s4  ;;  %v297_v45 = vpack.c.bf16 %v287_v35, %v295_v43  ;;  %v427_v9 = vrot.slane %v407_v38, 4  ;;  %v428_v10 = vrot.slane %v408_v39, 4 }
  0xd8   : > { %950 = vmatprep.subr.msk.bf16.mxu0 %vm305_vm10, %v298_v42 }
  0xd9   : > { %v307_v46 = vsel %vm305_vm10, %v297_v45, 0 }
  0xda   : > { %313 = vmatpush1.bf16.msra.mxu0 %v307_v46 }
  0xdb   : > { %1088 = vrot.lane.b32.xlu1 %v1087_v44, %s1284_s25  ;;  %1083 = vrot.lane.b32.xlu0 %v1087_v44, %s1281_s4 }
  0xdd   : > { %951 = vmatmul.mubr.msk.bf16.vlgmr.msra.gmra.mrb[0].mxu0 %vm301_vm11, %v300_v47 }
  0xde   : > { %394 = vmatprep.mubr.bf16.mxu0 %v1282_v3 }
 0x149   : > { %v1079_v48 = vpop.permute.xlu1 %1078  ;;  %v1074_v49 = vpop.permute.xlu0 %1073 }
 0x14a   : > { %v1081_v50 = vunpack.i.h.bf16 %v1079_v48  ;;  %v1080_v51 = vunpack.i.l.bf16 %v1079_v48  ;;  %v1076_v52 = vunpack.i.h.bf16 %v1074_v49  ;;  %v1075_v53 = vunpack.i.l.bf16 %v1074_v49 }
 0x14c   : > { %v251_v55 = vsel %vm250_vm8, %v1080_v51, %v1081_v50  ;;  %v252_v56 = vsel %vm250_vm8, %v1081_v50, %v1080_v51  ;;  %v244_v57 = vsel %vm213_vm0, %v1075_v53, %v1076_v52  ;;  %v245_v58 = vsel %vm213_vm0, %v1076_v52, %v1075_v53 }
 0x14d   : > { %v257_v60 = vsel %vm213_vm0, %v251_v55, %v245_v58  ;;  %v1089_v61 = vpop.permute.xlu1 %1088  ;;  %v1084_v62 = vpop.permute.xlu0 %1083  ;;  %v264_v63 = vsel %vm216_vm7, %v244_v57, %v252_v56  ;;  %v273_v1 = vsel %vm271_vm9, %v244_v57, %v268_v54 }
 0x14e   : > { %v1091_v2 = vunpack.i.h.bf16 %v1089_v61  ;;  %v1090_v4 = vunpack.i.l.bf16 %v1089_v61  ;;  %v1086_v7 = vunpack.i.h.bf16 %v1084_v62  ;;  %v1085_v8 = vunpack.i.l.bf16 %v1084_v62 }
 0x14f   : > { %v275_v11 = vpack.c.bf16 %v264_v63, %v273_v1  ;;  %v272_v12 = vsel %vm271_vm9, %v257_v60, %v267_v59 }
 0x150   : > { %v419_v13 = vsel %vm250_vm8, %v1090_v4, %v1091_v2  ;;  %v420_v14 = vsel %vm250_vm8, %v1091_v2, %v1090_v4  ;;  %v413_v17 = vsel %vm213_vm0, %v1085_v8, %v1086_v7  ;;  %v414_v20 = vsel %vm213_vm0, %v1086_v7, %v1085_v8 }
 0x151   : > { %v421_v21 = vsel %vm213_vm0, %v419_v13, %v414_v20  ;;  %952 = vmatprep.subr.msk.bf16.mxu0 %vm305_vm10, %v275_v11  ;;  %v274_v22 = vpack.c.bf16 %v251_v55, %v272_v12  ;;  %v424_v23 = vsel %vm216_vm7, %v413_v17, %v420_v14  ;;  %v432_v24 = vsel %vm271_vm9, %v413_v17, %v428_v10 }
 0x152   : > { %v434_v25 = vpack.c.bf16 %v424_v23, %v432_v24  ;;  %v431_v26 = vsel %vm271_vm9, %v421_v21, %v427_v9 }
 0x153   : > { %v357_v27 = vsel %vm305_vm10, %v274_v22, 0  ;;  %v433_v28 = vpack.c.bf16 %v419_v13, %v431_v26 }
 0x154   : > { %363 = vmatpush1.bf16.msra.mxu0 %v357_v27 }
 0x155   : > { %954 = vmatprep.subr.msk.bf16.mxu0 %vm305_vm10, %v434_v25  ;;  %v441_v30 = vsel %vm305_vm10, %v433_v28, 0 }
 0x157   : > { %953 = vmatmul.mubr.msk.bf16.vlgmr.msra.gmra.mrb[0].mxu0 %vm301_vm11, %v276_v29 }
 0x158   : > { %447 = vmatpush1.bf16.msra.mxu0 %v441_v30  ;;  %478 = vmatprep.mubr.bf16.mxu0 %v1282_v3 }
 0x163   : > { %955 = vmatmul.mubr.msk.bf16.vlgmr.msra.gmra.mrb[0].mxu0 %vm301_vm11, %v436_v31 }
 0x236   : > { %v480_v32 = vpop.f32.mrb[0].mxu0 }
 0x237   : > { %v494_v33 = vmul.f32 %v480_v32, %v480_v32  ;;  %v482_v34 = vpop.f32.mrb[1].mxu0  ;;  %v489_v35 = vsel %vm271_vm9, %v480_v32, 0.0 }
 0x238   : > { %v495_v36 = vmul.f32 %v482_v34, %v482_v34  ;;  %v484_v37 = vpop.f32.mrb[2].mxu0  ;;  %v490_v38 = vsel %vm271_vm9, %v482_v34, 0.0 }
 0x239   : > { %v485_v39 = vpop.f32.mrb[3].mxu0  ;;  %v491_v40 = vadd.f32 %v490_v38, %v489_v35  ;;  %v496_v41 = vsel %vm271_vm9, %v494_v33, 0.0 }
 0x23a   : > { %v497_v42 = vsel %vm271_vm9, %v495_v36, 0.0 }
 0x23b   : > { %492 = vadd.xlane.f32.xlu0 %v491_v40  ;;  %v498_v43 = vadd.f32 %v497_v42, %v496_v41  ;;  %v1285_v40 = vmov -1.0  }
 0x23d   : > { %499 = vadd.xlane.f32.xlu1 %v498_v43 }
 0x2c8   : > { %v493_v44 = vpop.xlane.xlu0 %492 }
 0x2c9   : > { %v501_v45 = vmul.f32 0.00390625, %v493_v44 }
 0x2ca   : > { %v500_v46 = vpop.xlane.xlu1 %499 }
 0x2cb   : > { %v502_v47 = vmul.f32 0.00390625, %v500_v46  ;;  %v503_v48 = vmul.f32 %v501_v45, %v501_v45  ;;  %v506_v52 = vsub.f32 %v480_v32, %v501_v45  ;;  %v507_v53 = vsub.f32 %v482_v34, %v501_v45 }
 0x2cd   : > { %v504_v49 = vsub.f32 %v502_v47, %v503_v48 }
 0x2cf   : > { %v505_v50 = vmax.f32 %v504_v49, 0.0 }
 0x2d1   : > { %v508_v51 = vadd.f32 1e-05, %v505_v50 }
 0x2d3   : > { %1134 = vrsqrt.f32 %v508_v51 }
 0x2dd   : > { %v1135_v54 = vpop.eup %1134 }
 0x2de   : > { %v510_v55 = vmul.f32 %v1135_v54, %v506_v52  ;;  %v511_v56 = vmul.f32 %v1135_v54, %v507_v53 }
 0x2e0   : > { %v514_v57 = vmul.f32 0.70710677, %v510_v55  ;;  %v515_v58 = vmul.f32 0.70710677, %v511_v56  ;;  %v512_v46 = vmul.f32 0.5, %v510_v55  ;;  %v513_v48 = vmul.f32 0.5, %v511_v56 }
 0x2e2   : > { %v520_v59 = vand.u32 2147483647, %v514_v57  ;;  %v521_v60 = vand.u32 2147483647, %v515_v58  ;;  %vm516_vm12 = vcmp.ge.f32.partialorder %v514_v57, 0.0  ;;  %vm517_vm13 = vcmp.ge.f32.partialorder %v515_v58, 0.0 }
 0x2e3   : > { %v518_v41 = vsel %vm516_vm12, 1.0, %v1285_v40  ;;  %v519_v43 = vsel %vm517_vm13, 1.0, %v1285_v40 }
 0x2e4   : > { %v522_v61 = vmul.f32 0.3275911, %v520_v59  ;;  %v523_v62 = vmul.f32 0.3275911, %v521_v60  ;;  %v546_v2 = vsub.f32 0.0, %v520_v59  ;;  %v547_v4 = vsub.f32 0.0, %v521_v60 }
 0x2e6   : > { %v524_v63 = vadd.f32 1.0, %v522_v61  ;;  %v525_v1 = vadd.f32 1.0, %v523_v62  ;;  %v548_v8 = vmul.f32 %v546_v2, %v520_v59  ;;  %v549_v10 = vmul.f32 %v547_v4, %v521_v60 }
 0x2e8   : > { %1136 = vrcp.f32 %v524_v63  ;;  %v550_v14 = vmul.f32 1.442695, %v548_v8  ;;  %v552_v20 = vmul.f32 1.442695, %v549_v10 }
 0x2e9   : > { %1138 = vrcp.f32 %v525_v1 }
 0x2ea   : > { %1140 = vpow2.f32 %v550_v14 }
 0x2eb   : > { %1142 = vpow2.f32 %v552_v20 }
 0x2f2   : > { %v1137_v7 = vpop.eup %1136 }
 0x2f3   : > { %v1139_v9 = vpop.eup %1138  ;;  %v528_v11 = vmul.f32 1.0614054, %v1137_v7 }
 0x2f4   : > { %v529_v12 = vmul.f32 1.0614054, %v1139_v9  ;;  %v1141_v34 = vpop.eup %1140 }
 0x2f5   : > { %v530_v13 = vadd.f32 -1.4531521, %v528_v11  ;;  %v1143_v36 = vpop.eup %1142 }
 0x2f6   : > { %v531_v17 = vadd.f32 -1.4531521, %v529_v12 }
 0x2f7   : > { %v532_v21 = vmul.f32 %v1137_v7, %v530_v13 }
 0x2f8   : > { %v533_v22 = vmul.f32 %v1139_v9, %v531_v17 }
 0x2f9   : > { %v534_v23 = vadd.f32 1.4214138, %v532_v21 }
 0x2fa   : > { %v535_v24 = vadd.f32 1.4214138, %v533_v22 }
 0x2fb   : > { %v536_v25 = vmul.f32 %v1137_v7, %v534_v23 }
 0x2fc   : > { %v537_v26 = vmul.f32 %v1139_v9, %v535_v24 }
 0x2fd   : > { %v538_v27 = vadd.f32 -0.28449672, %v536_v25 }
 0x2fe   : > { %v539_v28 = vadd.f32 -0.28449672, %v537_v26 }
 0x2ff   : > { %v540_v29 = vmul.f32 %v1137_v7, %v538_v27 }
 0x300   : > { %v541_v30 = vmul.f32 %v1139_v9, %v539_v28  ;;  %v956_v28 = vld [vmem:[%s1719_s2 + $0x2] sm:$0x3] }
 0x301   : > { %v542_v31 = vadd.f32 0.2548296, %v540_v29 }
 0x302   : > { %v543_v32 = vadd.f32 0.2548296, %v541_v30 }
 0x303   : > { %v544_v33 = vmul.f32 %v1137_v7, %v542_v31 }
 0x304   : > { %v545_v35 = vmul.f32 %v1139_v9, %v543_v32 }
 0x305   : > { %v554_v37 = vmul.f32 %v1141_v34, %v544_v33 }
 0x306   : > { %v555_v38 = vmul.f32 %v1143_v36, %v545_v35 }
 0x307   : > { %v556_v39 = vsub.f32 1.0, %v554_v37 }
 0x308   : > { %v557_v42 = vsub.f32 1.0, %v555_v38 }
 0x309   : > { %v558_v44 = vmul.f32 %v556_v39, %v518_v41 }
 0x30a   : > { %v559_v45 = vmul.f32 %v557_v42, %v519_v43 }
 0x30b   : > { %v560_v47 = vadd.f32 1.0, %v558_v44 }
 0x30c   : > { %v561_v49 = vadd.f32 1.0, %v559_v45 }
 0x30d   : > { %v562_v50 = vmul.f32 %v560_v47, %v512_v46 }
 0x30e   : > { %v563_v51 = vmul.f32 %v561_v49, %v513_v48 }
 0x30f   : > { %v623_v23 = vrot.slane %v562_v50, 4 }
 0x310   : > { %v1097_v52 = vpack.i.bf16 %v563_v51, %v562_v50  ;;  %v624_v12 = vrot.slane %v563_v51, 4 }
 0x312   : > { %1098 = vrot.lane.b32.xlu1 %v1097_v52, %s1283_s18  ;;  %1093 = vrot.lane.b32.xlu0 %v1097_v52, %s1280_s20  ;;  %s845_s20 = scalar_lea.sflag [#allocation4], %s1443_s30  ;;  %s1210_s18 = scalar_lea.vmem %s1209_s22, 256 }
 0x316   : > { %1108 = vrot.lane.b32.xlu1 %v1097_v52, %s1284_s25  ;;  %1103 = vrot.lane.b32.xlu0 %v1097_v52, %s1281_s4 }
 0x384   : > { %v1099_v53 = vpop.permute.xlu1 %1098  ;;  %v1094_v54 = vpop.permute.xlu0 %1093 }
 0x385   : > { %v1101_v57 = vunpack.i.h.bf16 %v1099_v53  ;;  %v1100_v58 = vunpack.i.l.bf16 %v1099_v53  ;;  %v1096_v59 = vunpack.i.h.bf16 %v1094_v54  ;;  %v1095_v55 = vunpack.i.l.bf16 %v1094_v54 }
 0x387   : > { %v574_v56 = vsel %vm231_vm2, %v1100_v58, %v1101_v57  ;;  %v575_v60 = vsel %vm231_vm2, %v1101_v57, %v1100_v58  ;;  %v568_v61 = vsel %vm224_vm1, %v1095_v55, %v1096_v59  ;;  %v569_v62 = vsel %vm224_vm1, %v1096_v59, %v1095_v55 }
 0x388   : > { %v1109_v63 = vpop.permute.xlu1 %1108  ;;  %v1104_v1 = vpop.permute.xlu0 %1103  ;;  %v576_v2 = vsel %vm1478_vm3, %v574_v56, %v569_v62  ;;  %v577_v4 = vsel %vm1486_vm5, %v575_v60, %v568_v61  ;;  %v733_v13 = vsel %vm1482_vm4, %v569_v62, %v574_v56  ;;  %v734_v18 = vsel %vm1490_vm6, %v568_v61, %v575_v60 }
 0x389   : > { %v1111_v7 = vunpack.i.h.bf16 %v1109_v63  ;;  %v1110_v8 = vunpack.i.l.bf16 %v1109_v63  ;;  %v1106_v9 = vunpack.i.h.bf16 %v1104_v1  ;;  %v1105_v10 = vunpack.i.l.bf16 %v1104_v1 }
 0x38a   : > { %v1117_v11 = vpack.i.bf16 %v577_v4, %v576_v2  ;;  %v1127_v24 = vpack.i.bf16 %v734_v18, %v733_v13  ;;  %v597_v35 = vrot.slane %v577_v4, 4  ;;  %v596_v40 = vrot.slane %v576_v2, 4 }
 0x38b   : > { %v610_v14 = vsel %vm213_vm0, %v1106_v9, %v1105_v10  ;;  %v609_v17 = vsel %vm213_vm0, %v1105_v10, %v1106_v9  ;;  %v616_v15 = vsel %vm250_vm8, %v1111_v7, %v1110_v8  ;;  %v615_v22 = vsel %vm250_vm8, %v1110_v8, %v1111_v7 }
 0x38c   : > { %1118 = vrot.lane.b32.xlu1 %v1117_v11, %s1284_s25  ;;  %1113 = vrot.lane.b32.xlu0 %v1117_v11, %s1281_s4  ;;  %v620_v16 = vsel %vm216_vm7, %v609_v17, %v616_v15  ;;  %v628_v20 = vsel %vm271_vm9, %v609_v17, %v624_v12  ;;  %v617_v25 = vsel %vm213_vm0, %v615_v22, %v610_v14  ;;  %v753_v50 = vrot.slane %v733_v13, 4 }
 0x38d   : > { %v630_v21 = vpack.c.bf16 %v620_v16, %v628_v20  ;;  %v627_v19 = vsel %vm271_vm9, %v617_v25, %v623_v23  ;;  %v754_v51 = vrot.slane %v734_v18, 4 }
 0x38e   : > { %v629_v26 = vpack.c.bf16 %v615_v22, %v627_v19 }
 0x38f   : > { %957 = vmatprep.subr.msk.bf16.mxu1 %vm305_vm10, %v630_v21 }
 0x390   : > { %1128 = vrot.lane.b32.xlu1 %v1127_v24, %s1284_s25  ;;  %1123 = vrot.lane.b32.xlu0 %v1127_v24, %s1281_s4  ;;  %v637_v27 = vsel %vm305_vm10, %v629_v26, 0  ;;  %s1204_s4 = scalar_lea.vmem %s1675_s29, 128 }
 0x391   : > { %643 = vmatpush1.bf16.msra.mxu1 %v637_v27  ;;  %p1205_p4 = scmp.ne.s32.totalorder %s1675_s29, %s1204_s4  ;;  %p1212_p13 = scmp.lt.s32.totalorder %s1210_s18, %s1204_s4 }
 0x393   : > { %p1206_p6 = pnand %p1205_p4, %p1398_p12  ;;  %p1213_p3 = por %p1212_p13, %p1211_p10 }
 0x394   : > { %958 = vmatmul.mubr.msk.bf16.vlgmr.msra.gmra.mrb[0].mxu1 %vm301_vm11, %v956_v28 }
 0x395   : > { %724 = vmatprep.mubr.bf16.mxu1 %v1282_v3  ;;  %p1207_p8 = pneg %p1206_p6 }
 0x397   : > { %p1214_p7 = pnand %p1213_p3, %p1207_p8 }
 0x3fe   : > { %v1119_v29 = vpop.permute.xlu1 %1118  ;;  %v1114_v30 = vpop.permute.xlu0 %1113 }
 0x3ff   : > { %v1121_v31 = vunpack.i.h.bf16 %v1119_v29  ;;  %v1120_v32 = vunpack.i.l.bf16 %v1119_v29  ;;  %v1116_v33 = vunpack.i.h.bf16 %v1114_v30  ;;  %v1115_v34 = vunpack.i.l.bf16 %v1114_v30 }
 0x401   : > { %v588_v36 = vsel %vm250_vm8, %v1120_v32, %v1121_v31  ;;  %v589_v37 = vsel %vm250_vm8, %v1121_v31, %v1120_v32  ;;  %v582_v38 = vsel %vm213_vm0, %v1115_v34, %v1116_v33  ;;  %v583_v39 = vsel %vm213_vm0, %v1116_v33, %v1115_v34 }
 0x402   : > { %v590_v41 = vsel %vm213_vm0, %v588_v36, %v583_v39  ;;  %v1129_v42 = vpop.permute.xlu1 %1128  ;;  %v1124_v43 = vpop.permute.xlu0 %1123  ;;  %v593_v44 = vsel %vm216_vm7, %v582_v38, %v589_v37  ;;  %v601_v45 = vsel %vm271_vm9, %v582_v38, %v597_v35 }
 0x403   : > { %v1131_v46 = vunpack.i.h.bf16 %v1129_v42  ;;  %v1130_v47 = vunpack.i.l.bf16 %v1129_v42  ;;  %v1126_v48 = vunpack.i.h.bf16 %v1124_v43  ;;  %v1125_v49 = vunpack.i.l.bf16 %v1124_v43 }
 0x404   : > { %v603_v52 = vpack.c.bf16 %v593_v44, %v601_v45  ;;  %v600_v53 = vsel %vm271_vm9, %v590_v41, %v596_v40 }
 0x405   : > { %v745_v54 = vsel %vm250_vm8, %v1130_v47, %v1131_v46  ;;  %v746_v57 = vsel %vm250_vm8, %v1131_v46, %v1130_v47  ;;  %v739_v58 = vsel %vm213_vm0, %v1125_v49, %v1126_v48  ;;  %v740_v59 = vsel %vm213_vm0, %v1126_v48, %v1125_v49 }
 0x406   : > { %v747_v55 = vsel %vm213_vm0, %v745_v54, %v740_v59  ;;  %959 = vmatprep.subr.msk.bf16.mxu1 %vm305_vm10, %v603_v52  ;;  %v602_v56 = vpack.c.bf16 %v588_v36, %v600_v53  ;;  %v750_v60 = vsel %vm216_vm7, %v739_v58, %v746_v57  ;;  %v758_v61 = vsel %vm271_vm9, %v739_v58, %v754_v51 }
 0x407   : > { %v760_v62 = vpack.c.bf16 %v750_v60, %v758_v61  ;;  %v757_v63 = vsel %vm271_vm9, %v747_v55, %v753_v50 }
 0x408   : > { %v687_v1 = vsel %vm305_vm10, %v602_v56, 0  ;;  %v759_v2 = vpack.c.bf16 %v745_v54, %v757_v63 }
 0x409   : > { %693 = vmatpush1.bf16.msra.mxu1 %v687_v1 }
 0x40a   : > { %962 = vmatprep.subr.msk.bf16.mxu1 %vm305_vm10, %v760_v62  ;;  %v767_v4 = vsel %vm305_vm10, %v759_v2, 0 }
 0x40c   : > { %960 = vmatmul.mubr.msk.bf16.vlgmr.msra.gmra.mrb[0].mxu1 %vm301_vm11, %v604_v5 }
 0x40d   : > { %773 = vmatpush1.bf16.msra.mxu1 %v767_v4  ;;  %804 = vmatprep.mubr.bf16.mxu1 %v1282_v3 }
 0x418   : > { %963 = vmatmul.mubr.msk.bf16.vlgmr.msra.gmra.mrb[0].mxu1 %vm301_vm11, %v961_v6 }
 0x4eb   : > { %v806_v7 = vpop.f32.mrb[0].mxu1 }
 0x4ec   : > { %v820_v8 = vmul.f32 %v806_v7, %v806_v7  ;;  %v808_v9 = vpop.f32.mrb[1].mxu1  ;;  %v815_v10 = vsel %vm271_vm9, %v806_v7, 0.0 }
 0x4ed   : > { %v821_v11 = vmul.f32 %v808_v9, %v808_v9  ;;  %v810_v12 = vpop.f32.mrb[2].mxu1  ;;  %v816_v13 = vsel %vm271_vm9, %v808_v9, 0.0 }
 0x4ee   : > { %v811_v14 = vpop.f32.mrb[3].mxu1  ;;  %v817_v17 = vadd.f32 %v816_v13, %v815_v10  ;;  %v822_v15 = vsel %vm271_vm9, %v820_v8, 0.0 }
 0x4ef   : > { %v823_v3 = vsel %vm271_vm9, %v821_v11, 0.0 }
 0x4f0   : > { %818 = vadd.xlane.f32.xlu0 %v817_v17  ;;  %v824_v18 = vadd.f32 %v823_v3, %v822_v15 }
 0x4f2   : > { %825 = vadd.xlane.f32.xlu1 %v824_v18 }
 0x57d   : > { %v819_v16 = vpop.xlane.xlu0 %818 }
 0x57e   : > { %v827_v20 = vmul.f32 0.00390625, %v819_v16 }
 0x57f   : > { %v826_v21 = vpop.xlane.xlu1 %825 }
 0x580   : > { %v828_v22 = vmul.f32 0.00390625, %v826_v21  ;;  %v829_v23 = vmul.f32 %v827_v20, %v827_v20  ;;  %v832_v26 = vsub.f32 %v806_v7, %v827_v20  ;;  %v833_v27 = vsub.f32 %v808_v9, %v827_v20 }
 0x582   : > { %v830_v24 = vsub.f32 %v828_v22, %v829_v23 }
 0x584   : > { %v831_v25 = vmax.f32 %v830_v24, 0.0 }
 0x586   : > { %v834_v19 = vadd.f32 1e-05, %v831_v25 }
 0x588   : > { %1144 = vrsqrt.f32 %v834_v19 }
 0x592   : > { %v1145_v28 = vpop.eup %1144 }
 0x593   : > { %v836_v29 = vmul.f32 %v1145_v28, %v832_v26  ;;  %v837_v30 = vmul.f32 %v1145_v28, %v833_v27 }
 0x595   : > { %v840_v31 = vcombine.low %v836_v29, %v837_v30 }
 0x597   : > { %v842_v32 = vadd.f32 %v840_v31, %v1457_v0 }
 0x599   : > { %843 = vst [vmem:[%s201_s28] sm:$0xff] %v842_v32 }
 0x59a   : > { %1217 = shalt.err (!%p1214_p7)
}
 0x59b   : > { %s1218_s30 = scalar_lea.hbm %s1673_s7, 128  ;;  %s1222_s5 = scalar_lea.hbm %s1720_s3, 256 }
 0x59c   : > { %p1219_p9 = scmp.ne.s32.totalorder %s1673_s7, %s1218_s30  ;;  %p1223_p0 = scmp.lt.u32.totalorder %s1673_s7, %s1720_s3 }
 0x59d   : > { %p1224_p11 = scmp.lt.u32.totalorder %s1222_s5, %s1218_s30  ;;  %p1226_p4 = scmp.lt.u32.totalorder %s1218_s30, %s1673_s7 }
 0x59e   : > { %p1220_p2 = pnand %p1219_p9, %p1398_p12 }
 0x59f   : > { %p1225_p1 = por %p1224_p11, %p1223_p0 }
 0x5a0   : > { %p1221_p5 = pneg %p1220_p2 }
 0x5a1   : > { %p1227_p6 = por %p1226_p4, %p1225_p1 }
 0x5a3   : > { %p1228_p8 = pnand %p1227_p6, %p1221_p5 }
 0x5a5   : > { %1231 = shalt.err (!%p1228_p8)
}
 0x5a6   : > { %993 = dma.vmem_to_hbm [thread:$0]  (%p1398_p12), %s1675_s29, 128, %s1673_s7, %s845_s20  }
 0x5a7 PF: > { %s871_s10 = sand.u32 1, %s1262_s12   ;;  %p1743_p10 = scmp.ne.s32.totalorder %s1725_s19, 0 }
 0x5a8   : > { %p1744_p13 = scmp.ge.s32.totalorder %s1274_s15, 2  ;;  %s872_s11 = scalar_lea.sflag [#allocation4], %s871_s10 }
 0x5aa   : > { %p1004_p3 = pnand %p1744_p13, %p1743_p10 }
 0x5ac   : > { %1257 = dma.done.wait (!%p1004_p3), %s872_s11, 128  }
 0x5ad   : > { %1259 = vsyncadd (!%p1004_p3), %s872_s11, 4294967168  ;;  %p17_p7 = scmp.ge.s32.totalorder %s1363_s24, 4   ;;  %s1745_s12 = smov %s1266_s13 }
 0x5ae   : > { %s1746_s13 = smov %s1270_s14  ;;  %s1747_s14 = smov %s1394_s17 }
 0x5af   : > { %s1748_s15 = smov %s1363_s24  ;;  %19 = sbr.rel (!%p17_p7) target bundleno = 6 (0x6), region = 85 }
 0x5b6   :  { %877 = vsyncpa [#allocation3], 1 }
 0x5b7   :  { %879 = vsyncpa [#allocation3 + $0x1], 1 }
 0x5b8   :  { %880 = vsyncpa [#allocation6], 1 }
 0x5b9   :  { %881 = vsyncpa [#allocation4], 1 }
 0x5ba   :  { %883 = vsyncpa [#allocation4 + $0x1], 1 }

</bundles_post_ra>
